<compile_context>
chip_gen: v7x
topology: tpu7x:2x2x1
jax: 0.10.0
libtpu: 0.0.40
codegen_flags: <defaults>
</compile_context>

<pallas_src>
import jax
import jax.numpy as jnp
from jax.experimental import pallas as pl
from jax.experimental.pallas import tpu as pltpu

IN_FEATURES = 535
OUT_FEATURES = 379
TM_MAX = 512  # batch tile; double-buffered tiles + resident weight << VMEM limits


def _linear_relu_kernel(x_ref, wt_ref, b_ref, o_ref):
    # x_ref: (TM, 535) f32, wt_ref: (535, 379) bf16, b_ref: (1, 379) f32
    x = x_ref[...].astype(jnp.bfloat16)
    acc = jnp.dot(x, wt_ref[...], preferred_element_type=jnp.float32)
    acc = acc + b_ref[...]
    o_ref[...] = jnp.maximum(acc, 0.0).astype(o_ref.dtype)


def _linear_add_relu_kernel(x_ref, wt_ref, b_ref, add_ref, o_ref):
    x = x_ref[...].astype(jnp.bfloat16)
    acc = jnp.dot(x, wt_ref[...], preferred_element_type=jnp.float32)
    acc = acc + b_ref[...] + add_ref[...]
    o_ref[...] = jnp.maximum(acc, 0.0).astype(o_ref.dtype)


def prepare_params(w, b):
    """One-time parameter prep (outside the per-call path).

    w: (379, 535) f32 PyTorch nn.Linear weight -> transposed bf16 (535, 379)
    b: (379,)     f32 -> (1, 379) f32
    """
    wt = jnp.asarray(w, jnp.float32).T.astype(jnp.bfloat16)
    b2 = jnp.asarray(b, jnp.float32).reshape(1, OUT_FEATURES)
    return wt, b2


def _tile_m(batch):
    # Full-extent block for small batches (always layout-legal regardless of
    # divisibility); 512-row tiles (multiple of 8) for large batches, with the
    # ragged last tile masked by Pallas.
    return batch if batch <= TM_MAX else TM_MAX


def _pallas_forward(x, wt, b2, add):
    B = x.shape[0]
    tm = _tile_m(B)
    grid_m = pl.cdiv(B, tm)
    has_add = add is not None

    in_specs = [
        pl.BlockSpec((tm, IN_FEATURES), lambda i: (i, 0)),            # x tile
        pl.BlockSpec((IN_FEATURES, OUT_FEATURES), lambda i: (0, 0)),  # resident weight
        pl.BlockSpec((1, OUT_FEATURES), lambda i: (0, 0)),            # resident bias
    ]
    operands = [x, wt, b2]
    if has_add:
        in_specs.append(pl.BlockSpec((tm, OUT_FEATURES), lambda i: (i, 0)))
        operands.append(add)
        kernel = _linear_add_relu_kernel
    else:
        kernel = _linear_relu_kernel

    return pl.pallas_call(
        kernel,
        out_shape=jax.ShapeDtypeStruct((B, OUT_FEATURES), jnp.float32),
        grid_spec=pltpu.PrefetchScalarGridSpec(
            num_scalar_prefetch=0,
            grid=(grid_m,),
            in_specs=in_specs,
            out_specs=pl.BlockSpec((tm, OUT_FEATURES), lambda i: (i, 0)),
        ),
        compiler_params=pltpu.CompilerParams(
            dimension_semantics=("parallel",),
        ),
    )(*operands)


@jax.jit
def model_forward(x, wt, b2):
    """relu(x @ wt + b), weight=None path (no add stream at all)."""
    return _pallas_forward(x, wt, b2, None)


@jax.jit
def model_forward_add(x, wt, b2, add):
    """relu(x @ wt + b + add)."""
    return _pallas_forward(x, wt, b2, add)


def forward(x, wt, b2, weight=None):
    """Mirrors Model.forward(x, weight=None); dispatch specialized at Python level."""
    if weight is None:
        return model_forward(x, wt, b2)
    return model_forward_add(x, wt, b2, weight)


if __name__ == "__main__":
    key = jax.random.PRNGKey(0)
    k_x, k_w, k_b, k_add = jax.random.split(key, 4)

    B = 4
    x = jax.random.normal(k_x, (B, IN_FEATURES), jnp.float32)

    # Deterministic params, mimicking nn.Linear's uniform(-1/sqrt(fan_in), ...)
    bound = 1.0 / (IN_FEATURES ** 0.5)
    w = jax.random.uniform(
        k_w, (OUT_FEATURES, IN_FEATURES), jnp.float32, -bound, bound
    )
    b = jax.random.uniform(k_b, (OUT_FEATURES,), jnp.float32, -bound, bound)
    add = jax.random.normal(k_add, (B, OUT_FEATURES), jnp.float32)

    # One-time weight transpose + bf16 cast, outside the per-call path.
    wt, b2 = prepare_params(w, b)

    # Case 1: weight=None -> relu(linear(x))
    out1 = forward(x, wt, b2, None)
    jax.block_until_ready(out1)

    # Case 2: additive `weight` argument -> relu(linear(x) + weight)
    out2 = forward(x, wt, b2, add)
    jax.block_until_ready(out2)

    # Tight check vs a matching bf16-input / f32-accum reference.
    x_bf = x.astype(jnp.bfloat16)
    ref1_bf = jnp.maximum(
        jnp.dot(x_bf, wt, preferred_element_type=jnp.float32) + b, 0.0
    )
    ref2_bf = jnp.maximum(
        jnp.dot(x_bf, wt, preferred_element_type=jnp.float32) + b + add, 0.0
    )
    # Loose check vs the full-f32 PyTorch-equivalent reference.
    ref1_f32 = jnp.maximum(x @ w.T + b, 0.0)
    ref2_f32 = jnp.maximum(x @ w.T + b + add, 0.0)

    assert out1.shape == (B, OUT_FEATURES)
    assert out2.shape == (B, OUT_FEATURES)
    assert jnp.allclose(out1, ref1_bf, atol=1e-3, rtol=1e-3)
    assert jnp.allclose(out2, ref2_bf, atol=1e-3, rtol=1e-3)
    assert jnp.allclose(out1, ref1_f32, atol=3e-2, rtol=3e-2)
    assert jnp.allclose(out2, ref2_f32, atol=3e-2, rtol=3e-2)

    print("KERNEL_OK")
</pallas_src>

<mosaic_0001>
module attributes {stable_mosaic.version = 11 : i64} {
  func.func @_linear_relu_kernel(%arg0: i32, %arg1: memref<4x535xf32, #tpu.memory_space<vmem>>, %arg2: memref<535x379xbf16, #tpu.memory_space<vmem>>, %arg3: memref<1x379xf32, #tpu.memory_space<vmem>>, %arg4: memref<4x379xf32, #tpu.memory_space<vmem>>) attributes {dimension_semantics = [#tpu.dimension_semantics<parallel>], iteration_bounds = array<i64: 1>, scalar_prefetch = 0 : i64, scratch_operands = 0 : i64, tpu.core_type = #tpu.core_type<tc>, window_params = [{transform_indices = @transform_0, window_bounds = array<i64: 4, 535>}, {pipeline_mode = #tpu.pipeline_mode<synchronous>, transform_indices = @transform_1, window_bounds = array<i64: 535, 379>}, {pipeline_mode = #tpu.pipeline_mode<synchronous>, transform_indices = @transform_2, window_bounds = array<i64: 1, 379>}, {transform_indices = @transform_3, window_bounds = array<i64: 4, 379>}]} {
    %c0 = arith.constant 0 : index
    %c0_0 = arith.constant 0 : index
    %0 = vector.load %arg1[%c0, %c0_0] : memref<4x535xf32, #tpu.memory_space<vmem>>, vector<4x535xf32>
    %1 = arith.truncf %0 : vector<4x535xf32> to vector<4x535xbf16>
    %c0_1 = arith.constant 0 : index
    %c0_2 = arith.constant 0 : index
    %2 = vector.load %arg2[%c0_1, %c0_2] : memref<535x379xbf16, #tpu.memory_space<vmem>>, vector<535x379xbf16>
    %cst = arith.constant dense<0.000000e+00> : vector<4x379xf32>
    %3 = tpu.matmul %1, %2, %cst {dimension_numbers = #tpu.dot_dimension_numbers<[1], [0], [0], [1], [0, 0, 1, 1], [], []>} : vector<4x535xbf16>, vector<535x379xbf16>, vector<4x379xf32> -> vector<4x379xf32>
    %c0_3 = arith.constant 0 : index
    %c0_4 = arith.constant 0 : index
    %4 = vector.load %arg3[%c0_3, %c0_4] : memref<1x379xf32, #tpu.memory_space<vmem>>, vector<1x379xf32>
    %5 = vector.broadcast %4 : vector<1x379xf32> to vector<4x379xf32>
    %6 = arith.addf %3, %5 : vector<4x379xf32>
    %cst_5 = arith.constant 0.000000e+00 : f32
    %7 = vector.broadcast %cst_5 : f32 to vector<4x379xf32>
    %8 = arith.maximumf %6, %7 : vector<4x379xf32>
    %c0_6 = arith.constant 0 : index
    %c0_7 = arith.constant 0 : index
    %9 = vector.load %arg4[%c0_6, %c0_7] : memref<4x379xf32, #tpu.memory_space<vmem>>, vector<4x379xf32>
    tpu.vector_store %arg4[%c0_6, %c0_7], %8 {strides = array<i32>} : memref<4x379xf32, #tpu.memory_space<vmem>>, vector<4x379xf32>,
    return
  }
  func.func @transform_0(%arg0: i32) -> (i32, i32) {
    %c0_i32 = arith.constant 0 : i32
    %c0_i32_0 = arith.constant 0 : i32
    return %arg0, %c0_i32 : i32, i32
  }
  func.func @transform_1(%arg0: i32) -> (i32, i32) {
    %c0_i32 = arith.constant 0 : i32
    %c0_i32_0 = arith.constant 0 : i32
    %c0_i32_1 = arith.constant 0 : i32
    return %c0_i32, %c0_i32_0 : i32, i32
  }
  func.func @transform_2(%arg0: i32) -> (i32, i32) {
    %c0_i32 = arith.constant 0 : i32
    %c0_i32_0 = arith.constant 0 : i32
    %c0_i32_1 = arith.constant 0 : i32
    return %c0_i32, %c0_i32_0 : i32, i32
  }
  func.func @transform_3(%arg0: i32) -> (i32, i32) {
    %c0_i32 = arith.constant 0 : i32
    %c0_i32_0 = arith.constant 0 : i32
    return %arg0, %c0_i32 : i32, i32
  }
}

</mosaic_0001>

<bundles_post_ra>
// kernel: model_forward.1
= control target key start
LH: loop header
LB: loop body
LE: loop exit
PB: predicated region body
PF: predicated region fallthrough
CT: control target
= control target key end

     0   :  { %8 = vsyncpa [#allocation3], 0  ;;  %s1500_s0 = inlined_call_operand.hbm [shape: f32[4,535], index: 0, kind: input, shape index: {}]   ;;  %s1501_s1 = inlined_call_operand.hbm [shape: bf16[535,379], index: 1, kind: input, shape index: {}]   ;;  %s1502_s2 = inlined_call_operand.vmem [shape: f32[1,379], index: 2, kind: input, shape index: {}]   ;;  %s1503_s3 = inlined_call_operand.hbm [shape: f32[4,379], index: 3, kind: output, shape index: {}]  }
   0x1   :  { %9 = vsyncpa [#allocation6], 0 }
   0x2   :  { %10 = vsyncpa [#allocation4], 0  ;;  %s1414_s12 = smov [#allocation2]   ;;  %s1415_s14 = smov [#allocation5]  }
   0x3   :  { %s17_s13 = sshll.u32 %s1414_s12, 4  ;;  %s26_s15 = sshll.u32 %s1415_s14, 4  ;;  %s18_s13 = int_to_ptr.vmem [resolvable:$true] %s17_s13  ;;  %s1443_s15 = int_to_ptr.vmem [resolvable:$true] %s26_s15 }
   0x4   :  { %s1342_s18 = scalar_lea.hbm %s1500_s0, 320 }
   0x5   :  { %p1343_p0 = scmp.ne.s32.totalorder %s1500_s0, %s1342_s18  ;;  %p1346_p1 = scmp.lt.u32.totalorder %s1342_s18, %s1500_s0 }
   0x7   :  { %p1348_p2 = pnand %p1346_p1, %p1343_p0 }
   0x9   :  { %1351 = shalt.err (!%p1348_p2)
}
   0xa   :  { %s1352_s23 = scalar_lea.vmem %s18_s13, 320  ;;  %p1357_p4 = scmp.lt.s32.totalorder %s18_s13, %s18_s13 }
   0xb   :  { %p1353_p3 = scmp.ne.s32.totalorder %s18_s13, %s1352_s23  ;;  %p1358_p5 = scmp.lt.s32.totalorder %s1352_s23, %s1352_s23 }
   0xd   :  { %p1359_p6 = por %p1358_p5, %p1357_p4 }
   0xf   :  { %p1360_p7 = pnand %p1359_p6, %p1353_p3 }
  0x11   :  { %1363 = shalt.err (!%p1360_p7)
}
  0x12   :  { %20 = dma.hbm_to_vmem [thread:$0]  %s1500_s0, 320, %s18_s13, [#allocation3]  }
  0x13   :  { %s1364_s28 = scalar_lea.hbm %s1501_s1, 12864 }
  0x14   :  { %p1365_p8 = scmp.ne.s32.totalorder %s1501_s1, %s1364_s28  ;;  %p1368_p9 = scmp.lt.u32.totalorder %s1364_s28, %s1501_s1 }
  0x16   :  { %p1370_p10 = pnand %p1368_p9, %p1365_p8 }
  0x18   :  { %1373 = shalt.err (!%p1370_p10)
}
  0x19   :  { %s1374_s6 = scalar_lea.vmem %s1443_s15, 12864  ;;  %p1379_p12 = scmp.lt.s32.totalorder %s1443_s15, %s1443_s15 }
  0x1a   :  { %p1375_p11 = scmp.ne.s32.totalorder %s1443_s15, %s1374_s6  ;;  %p1380_p13 = scmp.lt.s32.totalorder %s1374_s6, %s1374_s6 }
  0x1c   :  { %p1381_p0 = por %p1380_p13, %p1379_p12 }
  0x1e   :  { %p1382_p1 = pnand %p1381_p0, %p1375_p11 }
  0x20   :  { %1385 = shalt.err (!%p1382_p1)
}
  0x21   :  { %s1416_s0 = smov 192   ;;  %s1417_s7 = smov 12  }
  0x22   :  { %32 = dma.hbm_to_vmem [thread:$0]  %s1501_s1, 12864, %s1443_s15, [#allocation6], %s1416_s0, %s1416_s0, %s1417_s7  }
  0x23   :  { %1408 = dma.done.wait [#allocation3], 320  }
  0x24   :  { %1409 = vsyncadd [#allocation3], 4294966976 }
  0x25   :  { %1410 = dma.done.wait [#allocation6], 12864  }
  0x26   :  { %1411 = vsyncadd [#allocation6], 4294954432  ;;  %v1418_v0 = vmov 0   ;;  %v1205_v1 = vld [vmem:[#allocation5 + $0x4] ss:$12 sps:$4 sm:$0xff]   ;;  %vm747_vm0 = vcmask 1042432  }
  0x27   :  { %874 = vmatprep.mubr.bf16.mxu1 %v1418_v0  ;;  %v1207_v2 = vld [vmem:[#allocation5] ss:$12 sps:$4 sm:$0xff]   ;;  %760 = vmatprep.subr.bf16.mxu0 %v1205_v1  ;;  %v1208_v3 = vld [vmem:[#allocation5 + $0x1c] ss:$12 sps:$4 sm:$0xff]   ;;  %v1210_v4 = vld [vmem:[#allocation5 + $0x18] ss:$12 sps:$4 sm:$0xff]  }
  0x28   :  { %761 = vmatpush1.bf16.msra.mxu0 %v1207_v2  ;;  %v1211_v5 = vld [vmem:[#allocation5 + $0x34] ss:$12 sps:$4 sm:$0xff]   ;;  %v1213_v6 = vld [vmem:[#allocation5 + $0x30] ss:$12 sps:$4 sm:$0xff]   ;;  %vm748_vm1 = vcmask 1043456   ;;  %v1419_v7 = vmov 65535  }
  0x29   :  { %762 = vmatprep.subr.bf16.mxu0 %v1208_v3  ;;  %v749_v8 = vsel %vm747_vm0, 4294967295, %v1419_v7  ;;  %v1220_v9 = vld [vmem:[#allocation5 + $0x304] ss:$12 sps:$4 sm:$0xff]   ;;  %v1214_v10 = vld [vmem:[#allocation5 + $0x4c] ss:$12 sps:$4 sm:$0xff]   ;;  %vm743_vm2 = vcmask 187392  }
  0x2a   :  { %v1224_v11 = vld [vmem:[#allocation5 + $0x300] ss:$12 sps:$4 sm:$0xff]   ;;  %842 = vmatprep.subr.bf16.mxu1 %v1220_v9  ;;  %v188_v12 = vld [vmem:[#allocation5 + $0x318] sm:$0xff]  ;;  %v1474_v13 = vsel %vm748_vm1, %v749_v8, 0  ;;  %v1216_v14 = vld [vmem:[#allocation5 + $0x48] ss:$12 sps:$4 sm:$0xff]  }
  0x2b   :  { %843 = vmatpush1.bf16.msra.mxu1 %v1224_v11  ;;  %v1129_v15 = vcombine.high %v188_v12, %v188_v12  ;;  %v1128_v16 = vcombine.low %v188_v12, %v188_v12  ;;  %v1217_v17 = vld [vmem:[#allocation5 + $0x64] ss:$12 sps:$4 sm:$0xff]   ;;  %v1231_v20 = vld [vmem:[#allocation5 + $0xc8] ss:$12 sps:$4 sm:$0xff]   ;;  %v44_v21 = vld [vmem:[#allocation2 + $0x10] sm:$0xf] }
  0x2c   :  { %763 = vmatpush1.bf16.msra.mxu0 %v1210_v4  ;;  %v1219_v22 = vld [vmem:[#allocation5 + $0x60] ss:$12 sps:$4 sm:$0xff]   ;;  %v1222_v23 = vld [vmem:[#allocation5 + $0x7c] ss:$12 sps:$4 sm:$0xff]   ;;  %v1478_v24 = vpack.c.bf16 %v44_v21, %v44_v21  ;;  %v1225_v27 = vld [vmem:[#allocation5 + $0x78] ss:$12 sps:$4 sm:$0xff]  }
  0x2d   :  { %764 = vmatprep.subr.bf16.mxu0 %v1211_v5  ;;  %v755_v18 = vand.u32 %v1129_v15, %v1474_v13  ;;  %v752_v19 = vand.u32 %v1128_v16, %v1474_v13  ;;  %v1234_v25 = vld [vmem:[#allocation5 + $0x8] ss:$12 sps:$4 sm:$0xff]   ;;  %v1236_v26 = vld [vmem:[#allocation5 + $0xe0] ss:$12 sps:$4 sm:$0xff]   ;;  %v1241_v30 = vld [vmem:[#allocation5 + $0xf8] ss:$12 sps:$4 sm:$0xff]  }
  0x2e   :  { %v1227_v28 = vld [vmem:[#allocation5 + $0x94] ss:$12 sps:$4 sm:$0xff]   ;;  %v1230_v31 = vld [vmem:[#allocation5 + $0x90] ss:$12 sps:$4 sm:$0xff]   ;;  %v1244_v32 = vld [vmem:[#allocation5 + $0x38] ss:$12 sps:$4 sm:$0xff]  }
  0x2f   :  { %844 = vmatprep.subr.bf16.mxu1 %v755_v18  ;;  %v1239_v29 = vld [vmem:[#allocation5 + $0x20] ss:$12 sps:$4 sm:$0xff]   ;;  %v1246_v34 = vld [vmem:[#allocation5 + $0x110] ss:$12 sps:$4 sm:$0xff]   ;;  %v1235_v35 = vld [vmem:[#allocation5 + $0xa8] ss:$12 sps:$4 sm:$0xff]  }
  0x30   :  { %765 = vmatpush1.bf16.msra.mxu0 %v1213_v6  ;;  %845 = vmatpush1.bf16.msra.mxu1 %v752_v19  ;;  %v1232_v33 = vld [vmem:[#allocation5 + $0xac] ss:$12 sps:$4 sm:$0xff]   ;;  %v1237_v36 = vld [vmem:[#allocation5 + $0xc4] ss:$12 sps:$4 sm:$0xff]   ;;  %v1251_v38 = vld [vmem:[#allocation5 + $0x128] ss:$12 sps:$4 sm:$0xff]  }
  0x31   :  { %766 = vmatprep.subr.bf16.mxu0 %v1214_v10  ;;  %1133 = vmatprep.subr.bf16.mxu1 %v1231_v20  ;;  %v1249_v37 = vld [vmem:[#allocation5 + $0x50] ss:$12 sps:$4 sm:$0xff]   ;;  %v1240_v39 = vld [vmem:[#allocation5 + $0xc0] ss:$12 sps:$4 sm:$0xff]   ;;  %v1254_v41 = vld [vmem:[#allocation5 + $0x68] ss:$12 sps:$4 sm:$0xff]  }
  0x32   :  { %v1242_v40 = vld [vmem:[#allocation5 + $0xdc] ss:$12 sps:$4 sm:$0xff]   ;;  %v1256_v42 = vld [vmem:[#allocation5 + $0x140] ss:$12 sps:$4 sm:$0xff]   ;;  %v1245_v43 = vld [vmem:[#allocation5 + $0xd8] ss:$12 sps:$4 sm:$0xff]  }
  0x33   :  { %1131 = vmatmul.mubr.msk.bf16.vlgmr.msra.gmra.mrb[0].mxu1 %vm743_vm2, %v1478_v24  ;;  %v1247_v44 = vld [vmem:[#allocation5 + $0xf4] ss:$12 sps:$4 sm:$0xff]   ;;  %v1261_v46 = vld [vmem:[#allocation5 + $0x158] ss:$12 sps:$4 sm:$0xff]   ;;  %v1250_v47 = vld [vmem:[#allocation5 + $0xf0] ss:$12 sps:$4 sm:$0xff]  }
  0x34   :  { %767 = vmatpush1.bf16.msra.mxu0 %v1216_v14  ;;  %1134 = vmatpush3.bf16.msra.mxu1 %v1234_v25  ;;  %v1259_v45 = vld [vmem:[#allocation5 + $0x80] ss:$12 sps:$4 sm:$0xff]   ;;  %v1264_v50 = vld [vmem:[#allocation5 + $0x98] ss:$12 sps:$4 sm:$0xff]   ;;  %v1266_v52 = vld [vmem:[#allocation5 + $0x170] ss:$12 sps:$4 sm:$0xff]  }
  0x35   :  { %768 = vmatprep.subr.bf16.mxu0 %v1217_v17  ;;  %1135 = vmatprep.subr.bf16.mxu1 %v1236_v26  ;;  %v1252_v48 = vld [vmem:[#allocation5 + $0x10c] ss:$12 sps:$4 sm:$0xff]   ;;  %v1255_v54 = vld [vmem:[#allocation5 + $0x108] ss:$12 sps:$4 sm:$0xff]   ;;  %v1257_v55 = vld [vmem:[#allocation5 + $0x124] ss:$12 sps:$4 sm:$0xff]  }
  0x36   :  { %v42_v49 = vld [vmem:[#allocation2] sm:$0xff]  ;;  %v1272_v57 = vld [vmem:[#allocation5 + $0x248] ss:$12 sps:$4 sm:$0xff]   ;;  %v1265_v63 = vld [vmem:[#allocation5 + $0x138] ss:$12 sps:$4 sm:$0xff]   ;;  %vm1421_vm3 = vmmov 0  }
  0x37   :  { %v47_v51 = vcombine.high %v42_v49, %v42_v49  ;;  %v1269_v56 = vld [vmem:[#allocation5 + $0xb0] ss:$12 sps:$4 sm:$0xff]   ;;  %v1260_v58 = vld [vmem:[#allocation5 + $0x120] ss:$12 sps:$4 sm:$0xff]   ;;  %v51_v60 = vpack.c.bf16 %v42_v49, %v42_v49  ;;  %v1275_v61 = vld [vmem:[#allocation5 + $0x188] ss:$12 sps:$4 sm:$0xff]  }
  0x38   :  { %769 = vmatpush1.bf16.msra.mxu0 %v1219_v22  ;;  %1136 = vmatpush3.bf16.msra.mxu1 %v1239_v29  ;;  %v1262_v59 = vld [vmem:[#allocation5 + $0x13c] ss:$12 sps:$4 sm:$0xff]   ;;  %v1277_v62 = vld [vmem:[#allocation5 + $0x260] ss:$12 sps:$4 sm:$0xff]   ;;  %v1282_v2 = vld [vmem:[#allocation5 + $0x278] ss:$12 sps:$4 sm:$0xff]  }
  0x39   :  { %770 = vmatprep.subr.bf16.mxu0 %v1222_v23  ;;  %1137 = vmatprep.subr.bf16.mxu1 %v1241_v30  ;;  %v52_v53 = vpack.c.bf16 %v47_v51, %v47_v51  ;;  %v1267_v0 = vld [vmem:[#allocation5 + $0x154] ss:$12 sps:$4 sm:$0xff]   ;;  %v1270_v3 = vld [vmem:[#allocation5 + $0x150] ss:$12 sps:$4 sm:$0xff]   ;;  %v1273_v4 = vld [vmem:[#allocation5 + $0x16c] ss:$12 sps:$4 sm:$0xff]  }
  0x3a   :  { %v1281_v1 = vld [vmem:[#allocation5 + $0x1a0] ss:$12 sps:$4 sm:$0xff]   ;;  %v1286_v5 = vld [vmem:[#allocation5 + $0x1b8] ss:$12 sps:$4 sm:$0xff]   ;;  %v1287_v6 = vld [vmem:[#allocation5 + $0x290] ss:$12 sps:$4 sm:$0xff]  }
  0x3b   :  { %915 = vmatprep.mubr.bf16.mxu1 %v52_v53  ;;  %792 = vmatprep.mubr.bf16.mxu0 %v52_v53  ;;  %v1276_v7 = vld [vmem:[#allocation5 + $0x168] ss:$12 sps:$4 sm:$0xff]   ;;  %v1291_v8 = vld [vmem:[#allocation5 + $0x1d0] ss:$12 sps:$4 sm:$0xff]   ;;  %v1278_v11 = vld [vmem:[#allocation5 + $0x180] ss:$12 sps:$4 sm:$0xff]  }
  0x3c   :  { %771 = vmatpush1.bf16.msra.mxu0 %v1225_v27  ;;  %1138 = vmatpush3.bf16.msra.mxu1 %v1244_v32  ;;  %v1280_v9 = vld [vmem:[#allocation5 + $0x184] ss:$12 sps:$4 sm:$0xff]   ;;  %v1292_v10 = vld [vmem:[#allocation5 + $0x2a8] ss:$12 sps:$4 sm:$0xff]   ;;  %v1297_v15 = vld [vmem:[#allocation5 + $0x2c0] ss:$12 sps:$4 sm:$0xff]  }
  0x3d   :  { %772 = vmatprep.subr.bf16.mxu0 %v1227_v28  ;;  %1139 = vmatprep.subr.bf16.mxu1 %v1246_v34  ;;  %v1285_v12 = vld [vmem:[#allocation5 + $0x19c] ss:$12 sps:$4 sm:$0xff]   ;;  %v43_v16 = vld [vmem:[#allocation2 + $0x8] sm:$0xff]  ;;  %v1301_v19 = vld [vmem:[#allocation5 + $0x200] ss:$12 sps:$4 sm:$0xff]   ;;  %vm1011_vm4 = vcmask 1002496  }
  0x3e   :  { %v1296_v14 = vld [vmem:[#allocation5 + $0x1e8] ss:$12 sps:$4 sm:$0xff]   ;;  %v1283_v17 = vld [vmem:[#allocation5 + $0x198] ss:$12 sps:$4 sm:$0xff]   ;;  %v48_v18 = vcombine.high %v43_v16, %v43_v16  ;;  %v1288_v23 = vld [vmem:[#allocation5 + $0x1b0] ss:$12 sps:$4 sm:$0xff]  }
  0x3f   :  { %v1290_v20 = vld [vmem:[#allocation5 + $0x1b4] ss:$12 sps:$4 sm:$0xff]   ;;  %v1302_v21 = vld [vmem:[#allocation5 + $0x2d8] ss:$12 sps:$4 sm:$0xff]   ;;  %v1307_v27 = vld [vmem:[#allocation5 + $0x2f0] ss:$12 sps:$4 sm:$0xff]  }
  0x40   :  { %773 = vmatpush1.bf16.msra.mxu0 %v1230_v31  ;;  %1140 = vmatpush3.bf16.msra.mxu1 %v1249_v37  ;;  %v54_v22 = vpack.c.bf16 %v48_v18, %v48_v18  ;;  %v1295_v25 = vld [vmem:[#allocation5 + $0x1cc] ss:$12 sps:$4 sm:$0xff]   ;;  %v1293_v28 = vld [vmem:[#allocation5 + $0x1c8] ss:$12 sps:$4 sm:$0xff]   ;;  %v1311_v29 = vld [vmem:[#allocation5 + $0x230] ss:$12 sps:$4 sm:$0xff]   ;;  %v53_v31 = vpack.c.bf16 %v43_v16, %v43_v16 }
  0x41   :  { %774 = vmatprep.subr.bf16.mxu0 %v1232_v33  ;;  %1141 = vmatprep.subr.bf16.mxu1 %v1251_v38  ;;  %v1306_v26 = vld [vmem:[#allocation5 + $0x218] ss:$12 sps:$4 sm:$0xff]   ;;  %v1298_v32 = vld [vmem:[#allocation5 + $0x1e0] ss:$12 sps:$4 sm:$0xff]   ;;  %v1316_v33 = vld [vmem:[#allocation5 + $0x308] ss:$12 sps:$4 sm:$0xff]  }
  0x42   :  { %v1300_v30 = vld [vmem:[#allocation5 + $0x1e4] ss:$12 sps:$4 sm:$0xff]   ;;  %v1320_v34 = vld [vmem:[#allocation5 + $0x320] ss:$0 sps:$4 sm:$0xff]   ;;  %v1327_v49 = vld [vmem:[#allocation5 + $0x288] ss:$12 sps:$4 sm:$0xff]  }
  0x43   :  { %v1303_v37 = vld [vmem:[#allocation5 + $0x1f8] ss:$12 sps:$4 sm:$0xff]   ;;  %v758_v38 = vand.u32 %v1320_v34, %v1474_v13  ;;  %v1323_v13 = vld [vmem:[#allocation5 + $0x25c] ss:$12 sps:$4 sm:$0xff]   ;;  %v1338_v53 = vld [vmem:[#allocation5 + $0x2d4] ss:$12 sps:$4 sm:$0xff]  }
  0x44   :  { %775 = vmatpush1.bf16.msra.mxu0 %v1235_v35  ;;  %1142 = vmatpush3.bf16.msra.mxu1 %v1254_v41  ;;  %v1305_v35 = vld [vmem:[#allocation5 + $0x1fc] ss:$12 sps:$4 sm:$0xff]   ;;  %v1315_v41 = vld [vmem:[#allocation5 + $0x22c] ss:$12 sps:$4 sm:$0xff]  }
  0x45   :  { %776 = vmatprep.subr.bf16.mxu0 %v1237_v36  ;;  %1143 = vmatprep.subr.bf16.mxu1 %v1256_v42  ;;  %v1420_v36 = vmov 0.0   ;;  %v1313_v42 = vld [vmem:[#allocation5 + $0x228] ss:$12 sps:$4 sm:$0xff]  }
  0x46   :  { %v1335_v51 = vld [vmem:[#allocation5 + $0x2bc] ss:$12 sps:$4 sm:$0xff]  }
  0x48   :  { %777 = vmatpush1.bf16.msra.mxu0 %v1240_v39  ;;  %1144 = vmatpush3.bf16.msra.mxu1 %v1259_v45  ;;  %v1310_v39 = vld [vmem:[#allocation5 + $0x214] ss:$12 sps:$4 sm:$0xff]   ;;  %v1321_v45 = vld [vmem:[#allocation5 + $0x258] ss:$12 sps:$4 sm:$0xff]  }
  0x49   :  { %778 = vmatprep.subr.bf16.mxu0 %v1242_v40  ;;  %1145 = vmatprep.subr.bf16.mxu1 %v1261_v46  ;;  %v1308_v40 = vld [vmem:[#allocation5 + $0x210] ss:$12 sps:$4 sm:$0xff]   ;;  %v1326_v46 = vld [vmem:[#allocation5 + $0x274] ss:$12 sps:$4 sm:$0xff]  }
  0x4c   :  { %779 = vmatpush1.bf16.msra.mxu0 %v1245_v43  ;;  %1146 = vmatpush3.bf16.msra.mxu1 %v1264_v50  ;;  %v1319_v43 = vld [vmem:[#allocation5 + $0x244] ss:$12 sps:$4 sm:$0xff]   ;;  %v1330_v50 = vld [vmem:[#allocation5 + $0x2a0] ss:$12 sps:$4 sm:$0xff]  }
  0x4d   :  { %780 = vmatprep.subr.bf16.mxu0 %v1247_v44  ;;  %1147 = vmatprep.subr.bf16.mxu1 %v1266_v52  ;;  %v1317_v44 = vld [vmem:[#allocation5 + $0x240] ss:$12 sps:$4 sm:$0xff]   ;;  %v1333_v52 = vld [vmem:[#allocation5 + $0x2b8] ss:$12 sps:$4 sm:$0xff]  }
  0x50   :  { %781 = vmatpush1.bf16.msra.mxu0 %v1250_v47  ;;  %1148 = vmatpush3.bf16.msra.mxu1 %v1269_v56  ;;  %v1324_v47 = vld [vmem:[#allocation5 + $0x270] ss:$12 sps:$4 sm:$0xff]   ;;  %v1339_v56 = vld [vmem:[#allocation5 + $0x2e8] ss:$12 sps:$4 sm:$0xff]  }
  0x51   :  { %782 = vmatprep.subr.bf16.mxu0 %v1252_v48  ;;  %1155 = vmatprep.subr.bf16.mxu1 %v1272_v57  ;;  %v1329_v48 = vld [vmem:[#allocation5 + $0x28c] ss:$12 sps:$4 sm:$0xff]  }
  0x53   :  { %916 = vmatmul.mubr.bf16.vlgmr.msra.gmra.mrb[4].mxu1 %v51_v60 }
  0x54   :  { %783 = vmatpush1.bf16.msra.mxu0 %v1255_v54  ;;  %1156 = vmatpush3.bf16.msra.mxu1 %v1275_v61  ;;  %v1336_v54 = vld [vmem:[#allocation5 + $0x2d0] ss:$12 sps:$4 sm:$0xff]  }
  0x55   :  { %784 = vmatprep.subr.bf16.mxu0 %v1257_v55  ;;  %1157 = vmatprep.subr.bf16.mxu1 %v1277_v62  ;;  %v1341_v55 = vld [vmem:[#allocation5 + $0x2ec] ss:$12 sps:$4 sm:$0xff]  }
  0x56   :  { %955 = vmatprep.mubr.bf16.mxu1 %v54_v22 }
  0x58   :  { %785 = vmatpush1.bf16.msra.mxu0 %v1260_v58  ;;  %1158 = vmatpush3.bf16.msra.mxu1 %v1281_v1 }
  0x59   :  { %786 = vmatprep.subr.bf16.mxu0 %v1262_v59  ;;  %1159 = vmatprep.subr.bf16.mxu1 %v1282_v2  ;;  %v192_v2 = vlaneseq }
  0x5c   :  { %787 = vmatpush1.bf16.msra.mxu0 %v1265_v63  ;;  %1160 = vmatpush3.bf16.msra.mxu1 %v1286_v5  ;;  %v190_v5 = vld [vmem:[%s1502_s2] sm:$0x7]  ;;  %s1422_s2 = smov [#allocation7]  }
  0x5d   :  { %788 = vmatprep.subr.bf16.mxu0 %v1267_v0  ;;  %1161 = vmatprep.subr.bf16.mxu1 %v1287_v6  ;;  %s1019_s11 = sshll.u32 %s1422_s2, 4  ;;  %s1020_s11 = int_to_ptr.vmem [resolvable:$true] %s1019_s11 }
  0x5e   :  { %s1386_s12 = scalar_lea.vmem %s1020_s11, 192  ;;  %p1391_p3 = scmp.lt.s32.totalorder %s1020_s11, %s1020_s11 }
  0x5f   :  { %p1387_p2 = scmp.ne.s32.totalorder %s1020_s11, %s1386_s12  ;;  %p1392_p4 = scmp.lt.s32.totalorder %s1386_s12, %s1386_s12 }
  0x60   :  { %789 = vmatpush1.bf16.msra.mxu0 %v1270_v3  ;;  %1162 = vmatpush3.bf16.msra.mxu1 %v1291_v8  ;;  %v193_v3 = vshrl.u32 %v192_v2, 7 }
  0x61   :  { %790 = vmatprep.subr.bf16.mxu0 %v1273_v4  ;;  %1163 = vmatprep.subr.bf16.mxu1 %v1292_v10  ;;  %p1393_p5 = por %p1392_p4, %p1391_p3 }
  0x62   :  { %v202_v4 = vsub.s32 2, %v193_v3 }
  0x63   :  { %p1394_p6 = pnand %p1393_p5, %p1387_p2 }
  0x64   :  { %791 = vmatpush1.bf16.msra.mxu0 %v1276_v7  ;;  %1164 = vmatpush3.bf16.msra.mxu1 %v1296_v14  ;;  %v203_v6 = vrot.slane %v190_v5, %v202_v4 }
  0x65   :  { %801 = vmatprep.subr.bf16.mxu0 %v1280_v9  ;;  %1165 = vmatprep.subr.bf16.mxu1 %v1297_v15 }
  0x67   :  { %793 = vmatmul.mubr.bf16.vlgmr.msra.gmra.mrb[0].mxu0 %v51_v60 }
  0x68   :  { %802 = vmatpush1.bf16.msra.mxu0 %v1278_v11  ;;  %833 = vmatprep.mubr.bf16.mxu0 %v54_v22  ;;  %v198_v22 = vsub.s32 1, %v193_v3 }
  0x69   :  { %803 = vmatprep.subr.bf16.mxu0 %v1285_v12  ;;  %1166 = vmatpush3.bf16.msra.mxu1 %v1301_v19 }
  0x6a   :  { %1167 = vmatprep.subr.bf16.mxu1 %v1302_v21  ;;  %v194_v21 = vsub.s32 0, %v193_v3 }
  0x6c   :  { %804 = vmatpush1.bf16.msra.mxu0 %v1283_v17 }
  0x6d   :  { %805 = vmatprep.subr.bf16.mxu0 %v1290_v20  ;;  %1168 = vmatpush3.bf16.msra.mxu1 %v1306_v26 }
  0x6e   :  { %1169 = vmatprep.subr.bf16.mxu1 %v1307_v27 }
  0x70   :  { %806 = vmatpush1.bf16.msra.mxu0 %v1288_v23  ;;  %v195_v23 = vrot.slane %v190_v5, %v194_v21 }
  0x71   :  { %807 = vmatprep.subr.bf16.mxu0 %v1295_v25  ;;  %1170 = vmatpush3.bf16.msra.mxu1 %v1311_v29  ;;  %v199_v25 = vrot.slane %v190_v5, %v198_v22 }
  0x72   :  { %1180 = vmatprep.subr.bf16.mxu1 %v1420_v36 }
  0x74   :  { %808 = vmatpush1.bf16.msra.mxu0 %v1293_v28  ;;  %956 = vmatmul.mubr.bf16.vlgmr.msra.gmra.mrb[8].mxu1 %v53_v31 }
  0x75   :  { %809 = vmatprep.subr.bf16.mxu0 %v1300_v30  ;;  %1181 = vmatpush3.bf16.msra.mxu1 %v1316_v33 }
  0x76   :  { %1182 = vmatprep.subr.bf16.mxu1 %v1420_v36  ;;  %1184 = vmatprep.mubr.msk.bf16.mxu1 %vm1421_vm3, %v1420_v36 }
  0x78   :  { %810 = vmatpush1.bf16.msra.mxu0 %v1298_v32 }
  0x79   :  { %811 = vmatprep.subr.bf16.mxu0 %v1305_v35  ;;  %1183 = vmatpush3.bf16.msra.mxu1 %v758_v38 }
  0x7c   :  { %812 = vmatpush1.bf16.msra.mxu0 %v1303_v37  ;;  %1185 = vmatmul.mubr.msk.bf16.vlgmr.msra.gmra.mrb[12].mxu1 %vm743_vm2, %v1478_v24  ;;  %v1332_v24 = vld [vmem:[#allocation5 + $0x2a4] ss:$12 sps:$4 sm:$0xff]  }
  0x7d   :  { %813 = vmatprep.subr.bf16.mxu0 %v1310_v39 }
  0x80   :  { %814 = vmatpush1.bf16.msra.mxu0 %v1308_v40 }
  0x81   :  { %815 = vmatprep.subr.bf16.mxu0 %v1315_v41 }
  0x84   :  { %816 = vmatpush1.bf16.msra.mxu0 %v1313_v42 }
  0x85   :  { %817 = vmatprep.subr.bf16.mxu0 %v1319_v43 }
  0x88   :  { %818 = vmatpush1.bf16.msra.mxu0 %v1317_v44 }
  0x89   :  { %819 = vmatprep.subr.bf16.mxu0 %v1323_v13 }
  0x8c   :  { %820 = vmatpush1.bf16.msra.mxu0 %v1321_v45 }
  0x8d   :  { %821 = vmatprep.subr.bf16.mxu0 %v1326_v46 }
  0x90   :  { %822 = vmatpush1.bf16.msra.mxu0 %v1324_v47 }
  0x91   :  { %823 = vmatprep.subr.bf16.mxu0 %v1329_v48 }
  0x94   :  { %824 = vmatpush1.bf16.msra.mxu0 %v1327_v49 }
  0x95   :  { %825 = vmatprep.subr.bf16.mxu0 %v1332_v24 }
  0x98   :  { %826 = vmatpush1.bf16.msra.mxu0 %v1330_v50 }
  0x99   :  { %827 = vmatprep.subr.bf16.mxu0 %v1335_v51 }
  0x9c   :  { %828 = vmatpush1.bf16.msra.mxu0 %v1333_v52 }
  0x9d   :  { %829 = vmatprep.subr.bf16.mxu0 %v1338_v53 }
  0xa0   :  { %830 = vmatpush1.bf16.msra.mxu0 %v1336_v54 }
  0xa1   :  { %831 = vmatprep.subr.bf16.mxu0 %v1341_v55 }
  0xa4   :  { %832 = vmatpush1.bf16.msra.mxu0 %v1339_v56 }
  0xa7   :  { %834 = vmatmul.mubr.bf16.vlgmr.msra.gmra.mrb[0].mxu0 %v53_v31 }
 0x106   :  { %v876_v57 = vpop.f32.mrb[0].mxu1 }
 0x107   :  { %v878_v58 = vpop.f32.mrb[1].mxu1 }
 0x108   :  { %v880_v59 = vpop.f32.mrb[2].mxu1 }
 0x109   :  { %v881_v60 = vpop.f32.mrb[3].mxu1 }
 0x126   :  { %v1149_v61 = vpop.f32.mrb[4].mxu1 }
 0x127   :  { %v1150_v62 = vpop.f32.mrb[5].mxu1 }
 0x128   :  { %v1151_v63 = vadd.f32 %v1150_v62, %v1149_v61  ;;  %v1152_v0 = vpop.f32.mrb[6].mxu1 }
 0x129   :  { %v1153_v1 = vpop.f32.mrb[7].mxu1 }
 0x12a   :  { %v918_v7 = vadd.f32 %v1151_v63, %v203_v6 }
 0x147   :  { %v1171_v8 = vpop.f32.mrb[8].mxu1 }
 0x148   :  { %v1172_v9 = vpop.f32.mrb[9].mxu1 }
 0x149   :  { %v1173_v10 = vadd.f32 %v1172_v9, %v1171_v8  ;;  %v1174_v11 = vpop.f32.mrb[10].mxu1 }
 0x14a   :  { %v1175_v12 = vpop.f32.mrb[11].mxu1 }
 0x14b   :  { %v958_v14 = vadd.f32 %v1173_v10, %v918_v7 }
 0x14f   :  { %v997_v15 = vpop.f32.mrb[12].mxu1 }
 0x150   :  { %v998_v16 = vadd.f32 %v997_v15, %v958_v14  ;;  %v1186_v17 = vpop.f32.mrb[13].mxu1 }
 0x151   :  { %v1000_v18 = vpop.f32.mrb[14].mxu1 }
 0x152   :  { %v1005_v19 = vmax.f32 %v998_v16, 0.0  ;;  %v1187_v20 = vpop.f32.mrb[15].mxu1 }
 0x154   :  { %1012 = vst.msk [vmem:[#allocation7 + $0x8] sm:$0xf] %vm1011_vm4, %v1005_v19 }
 0x17a   :  { %v835_v26 = vpop.f32.mrb[0].mxu0 }
 0x17b   :  { %v1188_v27 = vadd.f32 %v835_v26, %v195_v23  ;;  %v837_v28 = vpop.f32.mrb[1].mxu0 }
 0x17c   :  { %v1190_v29 = vadd.f32 %v837_v28, %v199_v25  ;;  %v839_v30 = vpop.f32.mrb[2].mxu0 }
 0x17d   :  { %v1189_v31 = vadd.f32 %v1188_v27, %v876_v57  ;;  %v840_v32 = vpop.f32.mrb[3].mxu0 }
 0x17e   :  { %v1191_v33 = vadd.f32 %v1190_v29, %v878_v58 }
 0x17f   :  { %v1003_v34 = vmax.f32 %v1189_v31, 0.0 }
 0x180   :  { %v1004_v35 = vmax.f32 %v1191_v33, 0.0 }
 0x182   :  { %v1008_v36 = vcombine.low %v1003_v34, %v1004_v35 }
 0x184   :  { %1010 = vst [vmem:[#allocation7] sm:$0xff] %v1008_v36 }
 0x185   :  { %1397 = shalt.err (!%p1394_p6)
}
 0x186   :  { %s1398_s15 = scalar_lea.hbm %s1503_s3, 192 }
 0x187   :  { %p1399_p7 = scmp.ne.s32.totalorder %s1503_s3, %s1398_s15  ;;  %p1402_p8 = scmp.lt.u32.totalorder %s1398_s15, %s1503_s3 }
 0x189   :  { %p1404_p9 = pnand %p1402_p8, %p1399_p7 }
 0x18b   :  { %1407 = shalt.err (!%p1404_p9)
}
 0x18c   :  { %1022 = dma.vmem_to_hbm [thread:$0]  %s1020_s11, 192, %s1503_s3, [#allocation4]  }
 0x18d   :  { %1412 = dma.done.wait [#allocation4], 192  }
 0x18e   :  { %1413 = vsyncadd [#allocation4], 4294967104 }
 0x18f   :  { %1026 = vsyncpa [#allocation3], 1 }
 0x190   :  { %1027 = vsyncpa [#allocation6], 1 }
 0x191   :  { %1028 = vsyncpa [#allocation4], 1 }

</bundles_post_ra>
